<compile_context>
chip_gen: v7x
topology: tpu7x:2x2x1
jax: 0.10.0
libtpu: 0.0.40
codegen_flags: <defaults>
</compile_context>

<pallas_src>
import jax
import jax.numpy as jnp
from jax.experimental import pallas as pl
from jax.experimental.pallas import tpu as pltpu

_LANE = 128
_MAX_LANES = 2048               # cap on the lane-dense last dim of the 2D view
_TARGET_TILE_BYTES = 4 << 20    # ~4 MiB blocks: safe on v5e (16 MiB scoped VMEM
                                # with in+out double buffering) and plenty to
                                # saturate the DMA pipe on v6e/v7x.


def _copy_kernel(x_ref, o_ref):
    # Identity copy of one lane-dense block (the entire "compute" of SelectBand).
    o_ref[...] = x_ref[...]


def _identity_copy(x):
    """Optional materialized copy of a band through a lane-dense Pallas kernel."""
    total = int(x.size)
    if total == 0:
        return x

    # Widest last dim that is a multiple of 128 and divides the flat size.
    lanes = 0
    for cand in range(_MAX_LANES, _LANE - 1, -_LANE):
        if total % cand == 0:
            lanes = cand
            break

    if lanes == 0:
        # Flat size not a multiple of 128: single whole-array block
        # (block_shape == full array dims is always a legal layout).
        flat = x.reshape(1, total)
        out = pl.pallas_call(
            _copy_kernel,
            out_shape=jax.ShapeDtypeStruct(flat.shape, flat.dtype),
            grid=(1,),
            in_specs=[pl.BlockSpec(flat.shape, lambda i: (0, 0))],
            out_specs=pl.BlockSpec(flat.shape, lambda i: (0, 0)),
        )(flat)
        return out.reshape(x.shape)

    rows = total // lanes
    bytes_per_row = lanes * x.dtype.itemsize
    # Sublane granularity for packed dtypes: f32 -> 8, bf16 -> 16, int8 -> 32.
    sub = {4: 8, 2: 16, 1: 32}.get(x.dtype.itemsize, 8)
    block_rows = max(sub, (_TARGET_TILE_BYTES // bytes_per_row) // sub * sub)
    if block_rows >= rows:
        block_rows = rows       # block == full extent is always legal
    grid = (pl.cdiv(rows, block_rows),)

    flat = x.reshape(rows, lanes)
    out = pl.pallas_call(
        _copy_kernel,
        out_shape=jax.ShapeDtypeStruct((rows, lanes), x.dtype),
        grid=grid,
        in_specs=[pl.BlockSpec((block_rows, lanes), lambda i: (i, 0))],
        out_specs=pl.BlockSpec((block_rows, lanes), lambda i: (i, 0)),
        compiler_params=pltpu.CompilerParams(
            # "parallel" lets v7x shard the copy across its 2 TensorCores;
            # harmless no-op on v5e/v6e.
            dimension_semantics=("parallel",),
        ),
    )(flat)
    return out.reshape(x.shape)


class SelectBand:
    """JAX/Pallas port of the PyTorch SelectBand module.

    Default path is a zero-copy dict selection (identical to the PyTorch
    forward). Set materialize=True to force a fresh buffer via the Pallas
    identity-copy kernel.
    """

    def __init__(self, input_band_name, materialize=False):
        self.input_band_name = input_band_name
        self.materialize = materialize

    def __repr__(self):
        return "SelectBand(input_band_name={})".format(self.input_band_name)

    def __call__(self, xs):
        band = xs[self.input_band_name]
        if self.materialize:
            return _identity_copy(band)
        return band


if __name__ == "__main__":
    key = jax.random.PRNGKey(0)
    k1, k2 = jax.random.split(key)

    # Small synthetic "multi-band" input dict, NCHW.
    xs = {
        "rgb": jax.random.normal(k1, (2, 4, 16, 16), dtype=jnp.float32),
        "nir": jax.random.normal(k2, (2, 4, 16, 16), dtype=jnp.float32),
    }

    # Default (recommended) path: pure selection, no kernel, no HBM traffic.
    module = SelectBand("rgb")
    out = module(xs)

    # Materialized path: exercises the lane-dense Pallas copy kernel once.
    copied = SelectBand("nir", materialize=True)(xs)

    jax.block_until_ready((out, copied))

    assert out.shape == xs["rgb"].shape and out.dtype == xs["rgb"].dtype
    assert bool(jnp.allclose(out, xs["rgb"]))
    assert copied.shape == xs["nir"].shape and copied.dtype == xs["nir"].dtype
    assert bool(jnp.allclose(copied, xs["nir"]))

    print("KERNEL_OK")
</pallas_src>

<mosaic_0001>
module attributes {stable_mosaic.version = 11 : i64} {
  func.func @_copy_kernel(%arg0: i32, %arg1: memref<1x2048xf32, #tpu.memory_space<vmem>>, %arg2: memref<1x2048xf32, #tpu.memory_space<vmem>>) attributes {dimension_semantics = [#tpu.dimension_semantics<parallel>], iteration_bounds = array<i64: 1>, scalar_prefetch = 0 : i64, scratch_operands = 0 : i64, tpu.core_type = #tpu.core_type<tc>, window_params = [{transform_indices = @transform_0, window_bounds = array<i64: 1, 2048>}, {transform_indices = @transform_1, window_bounds = array<i64: 1, 2048>}]} {
    %c0 = arith.constant 0 : index
    %c0_0 = arith.constant 0 : index
    %0 = vector.load %arg1[%c0, %c0_0] : memref<1x2048xf32, #tpu.memory_space<vmem>>, vector<1x2048xf32>
    %c0_1 = arith.constant 0 : index
    %c0_2 = arith.constant 0 : index
    %1 = vector.load %arg2[%c0_1, %c0_2] : memref<1x2048xf32, #tpu.memory_space<vmem>>, vector<1x2048xf32>
    tpu.vector_store %arg2[%c0_1, %c0_2], %0 {strides = array<i32>} : memref<1x2048xf32, #tpu.memory_space<vmem>>, vector<1x2048xf32>,
    return
  }
  func.func @transform_0(%arg0: i32) -> (i32, i32) {
    %c0_i32 = arith.constant 0 : i32
    %c0_i32_0 = arith.constant 0 : i32
    return %arg0, %c0_i32 : i32, i32
  }
  func.func @transform_1(%arg0: i32) -> (i32, i32) {
    %c0_i32 = arith.constant 0 : i32
    %c0_i32_0 = arith.constant 0 : i32
    return %arg0, %c0_i32 : i32, i32
  }
}

</mosaic_0001>

<bundles_post_ra>
// kernel: tpu_custom_call.1
= control target key start
LH: loop header
LB: loop body
LE: loop exit
PB: predicated region body
PF: predicated region fallthrough
CT: control target
= control target key end

     0   :  { %6 = vsyncpa [#allocation3], 0  ;;  %s126_s0 = inlined_call_operand.hbm [shape: f32[1,2048], index: 0, kind: input, shape index: {}]   ;;  %s127_s1 = inlined_call_operand.hbm [shape: f32[1,2048], index: 1, kind: output, shape index: {}]  }
   0x1   :  { %7 = vsyncpa [#allocation4], 0  ;;  %s90_s6 = smov [#allocation2]   ;;  %s42_s10 = scalar_lea.hbm %s126_s0, 256 }
   0x2   :  { %s14_s7 = sshll.u32 %s90_s6, 4  ;;  %p43_p0 = scmp.ne.s32.totalorder %s126_s0, %s42_s10  ;;  %s15_s7 = int_to_ptr.vmem [resolvable:$true] %s14_s7 }
   0x3   :  { %p46_p1 = scmp.lt.u32.totalorder %s42_s10, %s126_s0 }
   0x5   :  { %p48_p2 = pnand %p46_p1, %p43_p0 }
   0x7   :  { %51 = shalt.err (!%p48_p2)
}
   0x8   :  { %s52_s15 = scalar_lea.vmem %s15_s7, 256  ;;  %p57_p4 = scmp.lt.s32.totalorder %s15_s7, %s15_s7 }
   0x9   :  { %p53_p3 = scmp.ne.s32.totalorder %s15_s7, %s52_s15  ;;  %p58_p5 = scmp.lt.s32.totalorder %s52_s15, %s52_s15 }
   0xb   :  { %p59_p6 = por %p58_p5, %p57_p4 }
   0xd   :  { %p60_p7 = pnand %p59_p6, %p53_p3 }
   0xf   :  { %63 = shalt.err (!%p60_p7)
}
  0x10   :  { %17 = dma.hbm_to_vmem [thread:$0]  %s126_s0, 256, %s15_s7, [#allocation3]  }
  0x11   :  { %86 = dma.done.wait [#allocation3], 256  }
  0x12   :  { %87 = vsyncadd [#allocation3], 4294967040  ;;  %s91_s18 = smov [#allocation5]   ;;  %v21_v0 = vld [vmem:[#allocation2] sm:$0xff]  ;;  %v22_v1 = vld [vmem:[#allocation2 + $0x8] sm:$0xff] }
  0x13   :  { %s31_s19 = sshll.u32 %s91_s18, 4  ;;  %23 = vst [vmem:[#allocation5] sm:$0xff] %v21_v0  ;;  %24 = vst [vmem:[#allocation5 + $0x8] sm:$0xff] %v22_v1  ;;  %s32_s19 = int_to_ptr.vmem [resolvable:$true] %s31_s19 }
  0x14   :  { %s64_s20 = scalar_lea.vmem %s32_s19, 256  ;;  %p69_p9 = scmp.lt.s32.totalorder %s32_s19, %s32_s19 }
  0x15   :  { %p65_p8 = scmp.ne.s32.totalorder %s32_s19, %s64_s20  ;;  %p70_p10 = scmp.lt.s32.totalorder %s64_s20, %s64_s20 }
  0x17   :  { %p71_p11 = por %p70_p10, %p69_p9 }
  0x19   :  { %p72_p12 = pnand %p71_p11, %p65_p8 }
  0x1b   :  { %75 = shalt.err (!%p72_p12)
}
  0x1c   :  { %s76_s0 = scalar_lea.hbm %s127_s1, 256 }
  0x1d   :  { %p77_p13 = scmp.ne.s32.totalorder %s127_s1, %s76_s0  ;;  %p80_p0 = scmp.lt.u32.totalorder %s76_s0, %s127_s1 }
  0x1f   :  { %p82_p1 = pnand %p80_p0, %p77_p13 }
  0x21   :  { %85 = shalt.err (!%p82_p1)
}
  0x22   :  { %34 = dma.vmem_to_hbm [thread:$0]  %s32_s19, 256, %s127_s1, [#allocation4]  }
  0x23   :  { %88 = dma.done.wait [#allocation4], 256  }
  0x24   :  { %89 = vsyncadd [#allocation4], 4294967040 }
  0x25   :  { %38 = vsyncpa [#allocation3], 1 }
  0x26   :  { %39 = vsyncpa [#allocation4], 1 }

</bundles_post_ra>
